<compile_context>
chip_gen: v5e
topology: v5e:2x2
jax: 0.10.0
libtpu: 0.0.40
codegen_flags: <defaults>
</compile_context>

<pallas_src>
import functools

import jax
import jax.numpy as jnp
from jax.experimental import pallas as pl
from jax.experimental.pallas import tpu as pltpu

KSIZE = 3
PAD = 1
NTAPS = KSIZE * KSIZE
# Tap offsets in (dh, dw) order; tap index t == kh*3 + kw with kh = dh+1, kw = dw+1.
OFFSETS = tuple((dh, dw) for dh in (-1, 0, 1) for dw in (-1, 0, 1))


def residual_block_kernel(x_ref, w1_ref, b1_ref, w2_ref, b2_ref, mask_ref, o_ref,
                          *, H, W, Bt):
    # x_ref:    (Bt, C, H*W)  lane-dense flattened images
    # w*_ref:   (C, 9*C)      fused im2col weights, column index = t*C + ci
    # b*_ref:   (C, 1)        biases (broadcast over lanes)
    # mask_ref: (9, H*W) f32  per-tap border-validity mask (precomputed on host)
    # o_ref:    (Bt, C, H*W)
    C = x_ref.shape[1]
    HW = H * W
    masks = mask_ref[...]                                     # (9, HW), loaded once

    def im2col(img):
        # img: (C, HW) f32 -> (9*C, HW) stack of shifted, zero-padded taps.
        taps = []
        for t, (dh, dw) in enumerate(OFFSETS):
            if dh == 0 and dw == 0:
                taps.append(img)
            else:
                # shifted[:, p] = img[:, p + dh*W + dw]  (zero outside the image)
                shift = (-(dh * W + dw)) % HW
                taps.append(pltpu.roll(img, shift, axis=1) * masks[t:t + 1, :])
        return jnp.concatenate(taps, axis=0)                  # (9C, HW)

    def conv3x3(imgs, w_ref, b_ref):
        # One fused dot per conv: (C, 9C) @ (9C, Bt*HW) -> (C, Bt*HW).
        cols = [im2col(img) for img in imgs]
        stk = cols[0] if Bt == 1 else jnp.concatenate(cols, axis=1)
        out = jnp.dot(w_ref[...].astype(jnp.float32), stk,
                      preferred_element_type=jnp.float32)
        out = out + b_ref[...].astype(jnp.float32)            # (C,1) lane-broadcast
        return [out[:, i * HW:(i + 1) * HW] for i in range(Bt)]

    xs = [x_ref[i].astype(jnp.float32) for i in range(Bt)]    # Bt x (C, HW)
    h1 = [jnp.maximum(y, 0.0) for y in conv3x3(xs, w1_ref, b1_ref)]   # conv1 + ReLU
    ys = conv3x3(h1, w2_ref, b2_ref)                                  # conv2
    for i in range(Bt):
        o_ref[i] = (ys[i] + xs[i]).astype(o_ref.dtype)                # + residual


def _fuse_weight(w):
    # (Co, Ci, kh, kw) -> (Co, 9*Ci); column index t*Ci + ci with t = kh*3 + kw,
    # matching the im2col row order (tap-major, channel-minor).
    c_out, c_in = w.shape[0], w.shape[1]
    return jnp.transpose(w, (0, 2, 3, 1)).reshape(c_out, NTAPS * c_in)


def _border_masks(H, W):
    HW = H * W
    pos = jnp.arange(HW, dtype=jnp.int32)
    hh = pos // W
    ww = pos % W
    rows = []
    for dh, dw in OFFSETS:
        valid = (hh + dh >= 0) & (hh + dh < H) & (ww + dw >= 0) & (ww + dw < W)
        rows.append(valid.astype(jnp.float32))
    return jnp.stack(rows, axis=0)                            # (9, HW)


def residual_block_pallas(x, w1, b1, w2, b2):
    """x: (B, C, H, W); w*: (C, C, 3, 3); b*: (C,). Matches PyTorch ResidualBlock."""
    B, C, H, W = x.shape
    HW = H * W

    # Grid: keep 2 steps for even B so both v7x TensorCores get work; single-TC
    # chips (v5e/v6e) pay only one extra ~600-cycle step for that.
    num_steps = 2 if (B >= 2 and B % 2 == 0) else 1
    Bt = B // num_steps

    x_flat = x.reshape(B, C, HW)
    w1_2d = _fuse_weight(w1)
    w2_2d = _fuse_weight(w2)
    b1_c = b1.reshape(C, 1)
    b2_c = b2.reshape(C, 1)
    mask = _border_masks(H, W)

    kernel = functools.partial(residual_block_kernel, H=H, W=W, Bt=Bt)

    out_flat = pl.pallas_call(
        kernel,
        out_shape=jax.ShapeDtypeStruct((B, C, HW), x.dtype),
        grid=(num_steps,),
        in_specs=[
            pl.BlockSpec((Bt, C, HW), lambda b: (b, 0, 0)),
            pl.BlockSpec((C, NTAPS * C), lambda b: (0, 0)),
            pl.BlockSpec((C, 1), lambda b: (0, 0)),
            pl.BlockSpec((C, NTAPS * C), lambda b: (0, 0)),
            pl.BlockSpec((C, 1), lambda b: (0, 0)),
            pl.BlockSpec((NTAPS, HW), lambda b: (0, 0)),
        ],
        out_specs=pl.BlockSpec((Bt, C, HW), lambda b: (b, 0, 0)),
        compiler_params=pltpu.CompilerParams(dimension_semantics=("parallel",)),
    )(x_flat, w1_2d, b1_c, w2_2d, b2_c, mask)

    return out_flat.reshape(B, C, H, W)


def residual_block_reference(x, w1, b1, w2, b2):
    """Plain-JAX reference mirroring the PyTorch forward exactly."""
    def conv(v, w, b):
        y = jax.lax.conv_general_dilated(
            v, w, (1, 1), ((PAD, PAD), (PAD, PAD)),
            dimension_numbers=("NCHW", "OIHW", "NCHW"))
        return y + b[None, :, None, None]

    h = jax.nn.relu(conv(x, w1, b1))
    return conv(h, w2, b2) + x


if __name__ == "__main__":
    B, C, H, W = 2, 4, 16, 16

    key = jax.random.PRNGKey(0)
    kx, kw1, kb1, kw2, kb2 = jax.random.split(key, 5)
    x = jax.random.normal(kx, (B, C, H, W), jnp.float32)
    w1 = jax.random.normal(kw1, (C, C, KSIZE, KSIZE), jnp.float32) * 0.1
    b1 = jax.random.normal(kb1, (C,), jnp.float32) * 0.1
    w2 = jax.random.normal(kw2, (C, C, KSIZE, KSIZE), jnp.float32) * 0.1
    b2 = jax.random.normal(kb2, (C,), jnp.float32) * 0.1

    out = residual_block_pallas(x, w1, b1, w2, b2)
    jax.block_until_ready(out)

    ref = residual_block_reference(x, w1, b1, w2, b2)
    err = float(jnp.max(jnp.abs(out - ref)))
    assert err < 1e-4, f"mismatch vs reference: max abs err = {err}"

    print("KERNEL_OK")
</pallas_src>

<mosaic_0001>
module attributes {stable_mosaic.version = 11 : i64} {
  func.func @residual_block_kernel(%arg0: i32, %arg1: memref<1x4x256xf32, #tpu.memory_space<vmem>>, %arg2: memref<4x36xf32, #tpu.memory_space<vmem>>, %arg3: memref<4x1xf32, #tpu.memory_space<vmem>>, %arg4: memref<4x36xf32, #tpu.memory_space<vmem>>, %arg5: memref<4x1xf32, #tpu.memory_space<vmem>>, %arg6: memref<9x256xf32, #tpu.memory_space<vmem>>, %arg7: memref<1x4x256xf32, #tpu.memory_space<vmem>>) attributes {dimension_semantics = [#tpu.dimension_semantics<parallel>], iteration_bounds = array<i64: 2>, scalar_prefetch = 0 : i64, scratch_operands = 0 : i64, tpu.core_type = #tpu.core_type<tc>, window_params = [{transform_indices = @transform_0, window_bounds = array<i64: 1, 4, 256>}, {pipeline_mode = #tpu.pipeline_mode<synchronous>, transform_indices = @transform_1, window_bounds = array<i64: 4, 36>}, {pipeline_mode = #tpu.pipeline_mode<synchronous>, transform_indices = @transform_2, window_bounds = array<i64: 4, 1>}, {pipeline_mode = #tpu.pipeline_mode<synchronous>, transform_indices = @transform_3, window_bounds = array<i64: 4, 36>}, {pipeline_mode = #tpu.pipeline_mode<synchronous>, transform_indices = @transform_4, window_bounds = array<i64: 4, 1>}, {pipeline_mode = #tpu.pipeline_mode<synchronous>, transform_indices = @transform_5, window_bounds = array<i64: 9, 256>}, {transform_indices = @transform_6, window_bounds = array<i64: 1, 4, 256>}]} {
    %c0 = arith.constant 0 : index
    %c0_0 = arith.constant 0 : index
    %0 = vector.load %arg6[%c0, %c0_0] : memref<9x256xf32, #tpu.memory_space<vmem>>, vector<9x256xf32>
    %c0_1 = arith.constant 0 : index
    %c0_2 = arith.constant 0 : index
    %c0_3 = arith.constant 0 : index
    %1 = vector.load %arg1[%c0_1, %c0_2, %c0_3] : memref<1x4x256xf32, #tpu.memory_space<vmem>>, vector<1x4x256xf32>
    %2 = vector.shape_cast %1 : vector<1x4x256xf32> to vector<4x256xf32>
    %c17_i32 = arith.constant 17 : i32
    %3 = tpu.dynamic_rotate %2 by %c17_i32 dim 1 : vector<4x256xf32>, i32 -> vector<4x256xf32>
    %4 = vector.extract_strided_slice %0 {offsets = [0, 0], sizes = [1, 256], strides = [1, 1]} : vector<9x256xf32> to vector<1x256xf32>
    %5 = vector.broadcast %4 : vector<1x256xf32> to vector<4x256xf32>
    %6 = arith.mulf %3, %5 : vector<4x256xf32>
    %c16_i32 = arith.constant 16 : i32
    %7 = tpu.dynamic_rotate %2 by %c16_i32 dim 1 : vector<4x256xf32>, i32 -> vector<4x256xf32>
    %8 = vector.extract_strided_slice %0 {offsets = [1, 0], sizes = [1, 256], strides = [1, 1]} : vector<9x256xf32> to vector<1x256xf32>
    %9 = vector.broadcast %8 : vector<1x256xf32> to vector<4x256xf32>
    %10 = arith.mulf %7, %9 : vector<4x256xf32>
    %c15_i32 = arith.constant 15 : i32
    %11 = tpu.dynamic_rotate %2 by %c15_i32 dim 1 : vector<4x256xf32>, i32 -> vector<4x256xf32>
    %12 = vector.extract_strided_slice %0 {offsets = [2, 0], sizes = [1, 256], strides = [1, 1]} : vector<9x256xf32> to vector<1x256xf32>
    %13 = vector.broadcast %12 : vector<1x256xf32> to vector<4x256xf32>
    %14 = arith.mulf %11, %13 : vector<4x256xf32>
    %c1_i32 = arith.constant 1 : i32
    %15 = tpu.dynamic_rotate %2 by %c1_i32 dim 1 : vector<4x256xf32>, i32 -> vector<4x256xf32>
    %16 = vector.extract_strided_slice %0 {offsets = [3, 0], sizes = [1, 256], strides = [1, 1]} : vector<9x256xf32> to vector<1x256xf32>
    %17 = vector.broadcast %16 : vector<1x256xf32> to vector<4x256xf32>
    %18 = arith.mulf %15, %17 : vector<4x256xf32>
    %c255_i32 = arith.constant 255 : i32
    %19 = tpu.dynamic_rotate %2 by %c255_i32 dim 1 : vector<4x256xf32>, i32 -> vector<4x256xf32>
    %20 = vector.extract_strided_slice %0 {offsets = [5, 0], sizes = [1, 256], strides = [1, 1]} : vector<9x256xf32> to vector<1x256xf32>
    %21 = vector.broadcast %20 : vector<1x256xf32> to vector<4x256xf32>
    %22 = arith.mulf %19, %21 : vector<4x256xf32>
    %c241_i32 = arith.constant 241 : i32
    %23 = tpu.dynamic_rotate %2 by %c241_i32 dim 1 : vector<4x256xf32>, i32 -> vector<4x256xf32>
    %24 = vector.extract_strided_slice %0 {offsets = [6, 0], sizes = [1, 256], strides = [1, 1]} : vector<9x256xf32> to vector<1x256xf32>
    %25 = vector.broadcast %24 : vector<1x256xf32> to vector<4x256xf32>
    %26 = arith.mulf %23, %25 : vector<4x256xf32>
    %c240_i32 = arith.constant 240 : i32
    %27 = tpu.dynamic_rotate %2 by %c240_i32 dim 1 : vector<4x256xf32>, i32 -> vector<4x256xf32>
    %28 = vector.extract_strided_slice %0 {offsets = [7, 0], sizes = [1, 256], strides = [1, 1]} : vector<9x256xf32> to vector<1x256xf32>
    %29 = vector.broadcast %28 : vector<1x256xf32> to vector<4x256xf32>
    %30 = arith.mulf %27, %29 : vector<4x256xf32>
    %c239_i32 = arith.constant 239 : i32
    %31 = tpu.dynamic_rotate %2 by %c239_i32 dim 1 : vector<4x256xf32>, i32 -> vector<4x256xf32>
    %32 = vector.extract_strided_slice %0 {offsets = [8, 0], sizes = [1, 256], strides = [1, 1]} : vector<9x256xf32> to vector<1x256xf32>
    %33 = vector.broadcast %32 : vector<1x256xf32> to vector<4x256xf32>
    %34 = arith.mulf %31, %33 : vector<4x256xf32>
    %35 = tpu.concatenate %6, %10, %14, %18, %2, %22, %26, %30, %34 in 0 : vector<4x256xf32>, vector<4x256xf32>, vector<4x256xf32>, vector<4x256xf32>, vector<4x256xf32>, vector<4x256xf32>, vector<4x256xf32>, vector<4x256xf32>, vector<4x256xf32> -> vector<36x256xf32>
    %c0_4 = arith.constant 0 : index
    %c0_5 = arith.constant 0 : index
    %36 = vector.load %arg2[%c0_4, %c0_5] : memref<4x36xf32, #tpu.memory_space<vmem>>, vector<4x36xf32>
    %cst = arith.constant dense<0.000000e+00> : vector<4x256xf32>
    %37 = tpu.matmul %36, %35, %cst {dimension_numbers = #tpu.dot_dimension_numbers<[1], [0], [0], [1], [0, 0, 1, 1], [], []>} : vector<4x36xf32>, vector<36x256xf32>, vector<4x256xf32> -> vector<4x256xf32>
    %c0_6 = arith.constant 0 : index
    %c0_7 = arith.constant 0 : index
    %38 = vector.load %arg3[%c0_6, %c0_7] : memref<4x1xf32, #tpu.memory_space<vmem>>, vector<4x1xf32>
    %39 = vector.broadcast %38 : vector<4x1xf32> to vector<4x256xf32>
    %40 = arith.addf %37, %39 : vector<4x256xf32>
    %cst_8 = arith.constant 0.000000e+00 : f32
    %41 = vector.broadcast %cst_8 : f32 to vector<4x256xf32>
    %42 = arith.maximumf %40, %41 : vector<4x256xf32>
    %c17_i32_9 = arith.constant 17 : i32
    %43 = tpu.dynamic_rotate %42 by %c17_i32_9 dim 1 : vector<4x256xf32>, i32 -> vector<4x256xf32>
    %44 = vector.extract_strided_slice %0 {offsets = [0, 0], sizes = [1, 256], strides = [1, 1]} : vector<9x256xf32> to vector<1x256xf32>
    %45 = vector.broadcast %44 : vector<1x256xf32> to vector<4x256xf32>
    %46 = arith.mulf %43, %45 : vector<4x256xf32>
    %c16_i32_10 = arith.constant 16 : i32
    %47 = tpu.dynamic_rotate %42 by %c16_i32_10 dim 1 : vector<4x256xf32>, i32 -> vector<4x256xf32>
    %48 = vector.extract_strided_slice %0 {offsets = [1, 0], sizes = [1, 256], strides = [1, 1]} : vector<9x256xf32> to vector<1x256xf32>
    %49 = vector.broadcast %48 : vector<1x256xf32> to vector<4x256xf32>
    %50 = arith.mulf %47, %49 : vector<4x256xf32>
    %c15_i32_11 = arith.constant 15 : i32
    %51 = tpu.dynamic_rotate %42 by %c15_i32_11 dim 1 : vector<4x256xf32>, i32 -> vector<4x256xf32>
    %52 = vector.extract_strided_slice %0 {offsets = [2, 0], sizes = [1, 256], strides = [1, 1]} : vector<9x256xf32> to vector<1x256xf32>
    %53 = vector.broadcast %52 : vector<1x256xf32> to vector<4x256xf32>
    %54 = arith.mulf %51, %53 : vector<4x256xf32>
    %c1_i32_12 = arith.constant 1 : i32
    %55 = tpu.dynamic_rotate %42 by %c1_i32_12 dim 1 : vector<4x256xf32>, i32 -> vector<4x256xf32>
    %56 = vector.extract_strided_slice %0 {offsets = [3, 0], sizes = [1, 256], strides = [1, 1]} : vector<9x256xf32> to vector<1x256xf32>
    %57 = vector.broadcast %56 : vector<1x256xf32> to vector<4x256xf32>
    %58 = arith.mulf %55, %57 : vector<4x256xf32>
    %c255_i32_13 = arith.constant 255 : i32
    %59 = tpu.dynamic_rotate %42 by %c255_i32_13 dim 1 : vector<4x256xf32>, i32 -> vector<4x256xf32>
    %60 = vector.extract_strided_slice %0 {offsets = [5, 0], sizes = [1, 256], strides = [1, 1]} : vector<9x256xf32> to vector<1x256xf32>
    %61 = vector.broadcast %60 : vector<1x256xf32> to vector<4x256xf32>
    %62 = arith.mulf %59, %61 : vector<4x256xf32>
    %c241_i32_14 = arith.constant 241 : i32
    %63 = tpu.dynamic_rotate %42 by %c241_i32_14 dim 1 : vector<4x256xf32>, i32 -> vector<4x256xf32>
    %64 = vector.extract_strided_slice %0 {offsets = [6, 0], sizes = [1, 256], strides = [1, 1]} : vector<9x256xf32> to vector<1x256xf32>
    %65 = vector.broadcast %64 : vector<1x256xf32> to vector<4x256xf32>
    %66 = arith.mulf %63, %65 : vector<4x256xf32>
    %c240_i32_15 = arith.constant 240 : i32
    %67 = tpu.dynamic_rotate %42 by %c240_i32_15 dim 1 : vector<4x256xf32>, i32 -> vector<4x256xf32>
    %68 = vector.extract_strided_slice %0 {offsets = [7, 0], sizes = [1, 256], strides = [1, 1]} : vector<9x256xf32> to vector<1x256xf32>
    %69 = vector.broadcast %68 : vector<1x256xf32> to vector<4x256xf32>
    %70 = arith.mulf %67, %69 : vector<4x256xf32>
    %c239_i32_16 = arith.constant 239 : i32
    %71 = tpu.dynamic_rotate %42 by %c239_i32_16 dim 1 : vector<4x256xf32>, i32 -> vector<4x256xf32>
    %72 = vector.extract_strided_slice %0 {offsets = [8, 0], sizes = [1, 256], strides = [1, 1]} : vector<9x256xf32> to vector<1x256xf32>
    %73 = vector.broadcast %72 : vector<1x256xf32> to vector<4x256xf32>
    %74 = arith.mulf %71, %73 : vector<4x256xf32>
    %75 = tpu.concatenate %46, %50, %54, %58, %42, %62, %66, %70, %74 in 0 : vector<4x256xf32>, vector<4x256xf32>, vector<4x256xf32>, vector<4x256xf32>, vector<4x256xf32>, vector<4x256xf32>, vector<4x256xf32>, vector<4x256xf32>, vector<4x256xf32> -> vector<36x256xf32>
    %c0_17 = arith.constant 0 : index
    %c0_18 = arith.constant 0 : index
    %76 = vector.load %arg4[%c0_17, %c0_18] : memref<4x36xf32, #tpu.memory_space<vmem>>, vector<4x36xf32>
    %cst_19 = arith.constant dense<0.000000e+00> : vector<4x256xf32>
    %77 = tpu.matmul %76, %75, %cst_19 {dimension_numbers = #tpu.dot_dimension_numbers<[1], [0], [0], [1], [0, 0, 1, 1], [], []>} : vector<4x36xf32>, vector<36x256xf32>, vector<4x256xf32> -> vector<4x256xf32>
    %c0_20 = arith.constant 0 : index
    %c0_21 = arith.constant 0 : index
    %78 = vector.load %arg5[%c0_20, %c0_21] : memref<4x1xf32, #tpu.memory_space<vmem>>, vector<4x1xf32>
    %79 = vector.broadcast %78 : vector<4x1xf32> to vector<4x256xf32>
    %80 = arith.addf %77, %79 : vector<4x256xf32>
    %81 = arith.addf %80, %2 : vector<4x256xf32>
    %c0_22 = arith.constant 0 : index
    %c0_23 = arith.constant 0 : index
    %c0_24 = arith.constant 0 : index
    %82 = vector.load %arg7[%c0_22, %c0_23, %c0_24] : memref<1x4x256xf32, #tpu.memory_space<vmem>>, vector<1x4x256xf32>
    %83 = vector.shape_cast %82 : vector<1x4x256xf32> to vector<4x256xf32>
    %84 = vector.shape_cast %81 : vector<4x256xf32> to vector<1x4x256xf32>
    tpu.vector_store %arg7[%c0_22, %c0_23, %c0_24], %84 {strides = array<i32>} : memref<1x4x256xf32, #tpu.memory_space<vmem>>, vector<1x4x256xf32>,
    return
  }
  func.func @transform_0(%arg0: i32) -> (i32, i32, i32) {
    %c0_i32 = arith.constant 0 : i32
    %c0_i32_0 = arith.constant 0 : i32
    %c0_i32_1 = arith.constant 0 : i32
    return %arg0, %c0_i32, %c0_i32_0 : i32, i32, i32
  }
  func.func @transform_1(%arg0: i32) -> (i32, i32) {
    %c0_i32 = arith.constant 0 : i32
    %c0_i32_0 = arith.constant 0 : i32
    %c0_i32_1 = arith.constant 0 : i32
    return %c0_i32, %c0_i32_0 : i32, i32
  }
  func.func @transform_2(%arg0: i32) -> (i32, i32) {
    %c0_i32 = arith.constant 0 : i32
    %c0_i32_0 = arith.constant 0 : i32
    %c0_i32_1 = arith.constant 0 : i32
    return %c0_i32, %c0_i32_0 : i32, i32
  }
  func.func @transform_3(%arg0: i32) -> (i32, i32) {
    %c0_i32 = arith.constant 0 : i32
    %c0_i32_0 = arith.constant 0 : i32
    %c0_i32_1 = arith.constant 0 : i32
    return %c0_i32, %c0_i32_0 : i32, i32
  }
  func.func @transform_4(%arg0: i32) -> (i32, i32) {
    %c0_i32 = arith.constant 0 : i32
    %c0_i32_0 = arith.constant 0 : i32
    %c0_i32_1 = arith.constant 0 : i32
    return %c0_i32, %c0_i32_0 : i32, i32
  }
  func.func @transform_5(%arg0: i32) -> (i32, i32) {
    %c0_i32 = arith.constant 0 : i32
    %c0_i32_0 = arith.constant 0 : i32
    %c0_i32_1 = arith.constant 0 : i32
    return %c0_i32, %c0_i32_0 : i32, i32
  }
  func.func @transform_6(%arg0: i32) -> (i32, i32, i32) {
    %c0_i32 = arith.constant 0 : i32
    %c0_i32_0 = arith.constant 0 : i32
    %c0_i32_1 = arith.constant 0 : i32
    return %arg0, %c0_i32, %c0_i32_0 : i32, i32, i32
  }
}

</mosaic_0001>

<bundles_post_ra>
// kernel: tpu_custom_call.1
= control target key start
LH: loop header
LB: loop body
LE: loop exit
PB: predicated region body
PF: predicated region fallthrough
CT: control target
= control target key end

     0   :  { %11 = vsyncpa [#allocation3], 0  ;;  %s1438_s0 = inlined_call_operand.hbm [shape: f32[2,4,256], index: 0, kind: input, shape index: {}]   ;;  %s1439_s1 = inlined_call_operand.vmem [shape: f32[4,36], index: 1, kind: input, shape index: {}]   ;;  %s1440_s2 = inlined_call_operand.vmem [shape: f32[4,1], index: 2, kind: input, shape index: {}]   ;;  %s1441_s3 = inlined_call_operand.vmem [shape: f32[4,36], index: 3, kind: input, shape index: {}]   ;;  %s1442_s4 = inlined_call_operand.vmem [shape: f32[4,1], index: 4, kind: input, shape index: {}]   ;;  %s1443_s5 = inlined_call_operand.hbm [shape: f32[9,256], index: 5, kind: input, shape index: {}]   ;;  %s1444_s6 = inlined_call_operand.hbm [shape: f32[2,4,256], index: 6, kind: output, shape index: {}]  }
   0x1   :  { %13 = vsyncpa [#allocation3 + $0x1], 0 }
   0x2   :  { %14 = vsyncpa [#allocation6], 0 }
   0x3   :  { %15 = vsyncpa [#allocation4], 0 }
   0x4   :  { %17 = vsyncpa [#allocation4 + $0x1], 0  ;;  %s1059_s21 = smov 0   ;;  %s1061_s22 = smov 0  }
   0x5   :  { %s1063_s23 = smov 0   ;;  %s1065_s24 = smov 0  }
   0x6 LB: > { %s208_s27 = sshll.u32 %s1443_s5, 4  ;;  %s1083_s28 = sadd.s32 4294967295, %s1010_s24   ;;  %s1010_s24 = sphi %s1065_s24, %s1454_s24   ;;  %s1006_s23 = sphi %s1063_s23, %s1453_s23   ;;  %s1002_s22 = sphi %s1061_s22, %s1452_s22   ;;  %s998_s21 = sphi %s1059_s21, %s1451_s21   ;;  %s209_s27 = int_to_ptr.hbm [resolvable:$true] %s208_s27 }
   0x7   : > { %p783_p0 = scmp.ge.s32.totalorder %s1010_s24, 1  ;;  %p44_p1 = scmp.eq.s32.totalorder %s1083_s28, 0 }
   0x8   : > { %p185_p2 = scmp.lt.s32.totalorder %s1010_s24, 3  ;;  %s1012_s30 = smov [#allocation5]  }
   0x9   : > { %s210_s7 = sshll.u32 %s1012_s30, 4  ;;  %s1013_s8 = smov 256   ;;  %s211_s7 = int_to_ptr.vmem [resolvable:$true] %s210_s7 }
   0xa   : > { %p1088_p3 = pnand %p783_p0, %p185_p2  ;;  %s1014_s9 = smov 16  }
   0xb   : > { %s782_s10 = sadd.s32 4294967294, %s1010_s24   ;;  %s1099_s11 = sadd.s32 1, %s1010_s24  }
   0xc   : > { %p816_p4 = pneg %p1088_p3  ;;  %s30_s12 = sadd.s32 1, %s1006_s23 }
   0xd   : > { %s27_s13 = ssub.s32 %s1010_s24, %s1099_s11  ;;  %p37_p7 = scmp.ne.s32.totalorder %s1006_s23, %s1002_s22 }
   0xe   : > { %p817_p6 = pnand %p816_p4, %p44_p1  ;;  %p28_p8 = scmp.eq.s32.totalorder %s27_s13, 0 }
   0xf   : > { %p38_p9 = scmp.eq.s32.totalorder %s1010_s24, 0  ;;  %p43_p10 = scmp.ne.s32.totalorder %s1002_s22, %s998_s21 }
  0x10   : > { %819 = dma.hbm_to_vmem [thread:$0]  (!%p817_p6), %s209_s27, 512, %s211_s7, [#allocation6], %s1013_s8, %s1013_s8, %s1014_s9  }
  0x11   : > { %p172_p11 = scmp.eq.s32.totalorder %s1083_s28, 1  ;;  %p1115_p12 = por %p44_p1, %p43_p10 }
  0x12   : > { %s1111_s14 = scalar_select %p28_p8, %s1006_s23, %s30_s12  }
  0x13   : > { %p1119_p13 = por %p172_p11, %p37_p7  ;;  %p178_p0 = scmp.eq.s32.totalorder %s782_s10, 1 }
  0x14   : > { %p39_p2 = por %p38_p9, %p37_p7  ;;  %s224_s17 = sand.u32 1, %s1006_s23  }
  0x15   : > { %p1124_p4 = por %p178_p0, %p43_p10  ;;  %p829_p6 = scmp.lt.s32.totalorder %s1010_s24, 2 }
  0x16   : > { %s786_s19 = sshll.u32 %s224_s17, 3  ;;  %s806_s20 = sshll.u32 %s1010_s24, 3 }
  0x17   : > { %s233_s27 = scalar_lea.hbm %s1438_s0, %s806_s20  ;;  %s228_s7 = scalar_lea.vmem [#allocation2], %s786_s19 }
  0x18   : > { %s235_s30 = sshll.u32 %s233_s27, 4  ;;  %s237_s8 = sshll.u32 %s228_s7, 4  ;;  %s236_s30 = int_to_ptr.hbm [resolvable:$true] %s235_s30  ;;  %s238_s8 = int_to_ptr.vmem [resolvable:$true] %s237_s8 }
  0x19   : > { %p1133_p8 = pnand %p829_p6, %p39_p2  ;;  %s225_s10 = scalar_lea.sflag [#allocation3], %s224_s17 }
  0x1a   : > { %s910_s12 = sshra.s32 %s236_s30, 4  ;;  %s917_s19 = scalar_lea.hbm %s1438_s0, 16  ;;  %s911_s12 = int_to_ptr.hbm [resolvable:$true] %s910_s12 }
  0x1b   : > { %s912_s13 = scalar_lea.hbm %s911_s12, 8  ;;  %p914_p9 = pneg %p1133_p8 }
  0x1c   : > { %p913_p7 = scmp.ne.s32.totalorder %s911_s12, %s912_s13  ;;  %p918_p0 = scmp.lt.s32.totalorder %s911_s12, %s1438_s0 }
  0x1d   : > { %p919_p2 = scmp.lt.s32.totalorder %s917_s19, %s912_s13 }
  0x1e   : > { %p915_p10 = pnand %p914_p9, %p913_p7 }
  0x1f   : > { %p920_p6 = por %p919_p2, %p918_p0 }
  0x20   : > { %p916_p11 = pneg %p915_p10 }
  0x22   : > { %p921_p5 = pnand %p920_p6, %p916_p11 }
  0x24   : > { %924 = shalt.err (!%p921_p5)
}
  0x25   : > { %823 = dma.hbm_to_vmem [thread:$0]  (!%p1133_p8), %s236_s30, 128, %s238_s8, %s225_s10  }
  0x26   : > { %246 = sbr.rel (%p1088_p3) target bundleno = 675 (0x2a3), region = 44  ;;  %s1150_s17 = sand.u32 (!%p1088_p3), 1, %s1002_s22  }
  0x27   : > { %s790_s7 = sshll.u32 (!%p1088_p3), %s1150_s17, 3  ;;  %s249_s20 = scalar_lea.sflag (!%p1088_p3), [#allocation3], %s1150_s17 }
  0x28   : > { %s252_s12 = scalar_lea.vmem (!%p1088_p3), [#allocation2], %s790_s7 }
  0x2b   : > { %985 = dma.done.wait (%p1115_p12), %s249_s20, 128  }
  0x2c   : > { %987 = vsyncadd (%p1115_p12), %s249_s20, 4294967168 }
  0x2d   : > { %989 = dma.done.wait (%p44_p1), [#allocation6], 512  }
  0x2e   : > { %991 = vsyncadd (%p44_p1), [#allocation6], 4294966784  ;;  %v291_v0 = vld [vmem:[%s252_s12] sm:$0xff]  ;;  %s1015_s29 = smov 16   ;;  %s1016_s15 = smov 15   ;;  %v302_v29 = vlaneseq  ;;  %v1023_v30 = vmov 0  }
  0x2f   : > { %293 = vst [vmem:[#allocation1] ss:$2 sm:$0xff] %v291_v0  ;;  %s1017_s30 = smov 1   ;;  %s1018_s8 = smov 127   ;;  %v462_v28 = vld [vmem:[%s1440_s2] sm:$0xf]  ;;  %876 = vset.pattern.permute.xlu1 %v1023_v30  ;;  %877 = vset.pattern.permute.xlu0 %v1023_v30 }
  0x30   : > { %s1019_s9 = smov 113   ;;  %s1020_s10 = smov 112   ;;  %v1191_v31 = vand.u32 127, %v302_v29  ;;  %v1194_v32 = vld [vmem:[#allocation5] sm:$0xff]  ;;  %v1196_v33 = vld [vmem:[#allocation5 + $0x8] sm:$0xff]  ;;  %vm452_vm6 = vcmask 1043456  }
  0x31   : > { %s1021_s13 = smov 17   ;;  %s1022_s25 = smov 111   ;;  %v403_v36 = vperm.slane %v1194_v32, 7  ;;  %v404_v37 = vperm.slane %v1196_v33, 7  ;;  %v323_v41 = vperm.slane %v1194_v32, 1  ;;  %v371_v42 = vperm.slane %v1194_v32, 5 }
  0x32   : > { %vm400_vm0 = vcmp.lt.s32.totalorder %v1191_v31, 112  ;;  %vm368_vm1 = vcmp.lt.s32.totalorder %v1191_v31, 127  ;;  %v372_v43 = vperm.slane %v1196_v33, 5  ;;  %v324_v44 = vperm.slane %v1196_v33, 1  ;;  %v1222_v51 = vld [vmem:[#allocation5 + $0x10] ss:$0 sm:$0xff] }
  0x33   : > { %v355_v45 = vperm.slane %v1194_v32, 3  ;;  %vm352_vm2 = vcmp.lt.s32.totalorder %v1191_v31, 1  ;;  %vm384_vm3 = vcmp.lt.s32.totalorder %v1191_v31, 113  ;;  %v356_v50 = vperm.slane %v1196_v33, 3  ;;  %v1224_v52 = vld [vmem:[#allocation5 + $0x18] ss:$0 sm:$0xff] }
  0x34   : > { %vm416_vm4 = vcmp.lt.s32.totalorder %v1191_v31, 111  ;;  %v387_v53 = vperm.slane %v1194_v32, 6  ;;  %v388_v54 = vperm.slane %v1196_v33, 6  ;;  %vm320_vm5 = vcmp.lt.s32.totalorder %v1191_v31, 16 }
  0x35   : > { %vm304_vm7 = vcmp.lt.s32.totalorder %v1191_v31, 17  ;;  %vm336_vm8 = vcmp.lt.s32.totalorder %v1191_v31, 15  ;;  %vm468_vm9 = vcmask 293888  }
  0x36   : > { %v294_v1 = vld.sshfl [vmem:[#allocation1] sm:$0xff pattern:$0x75316420]  ;;  %v295_v2 = vld.sshfl [vmem:[#allocation1 + $0x8] sm:$0xff pattern:$0x75316420] }
  0x37   : > { %311 = vst [vmem:[#allocation1] ss:$2 sm:$0xff] %v291_v0 }
  0x3e   : > { %v312_v3 = vld.sshfl [vmem:[#allocation1] sm:$0xff pattern:$0x75316420]  ;;  %v313_v4 = vld.sshfl [vmem:[#allocation1 + $0x8] sm:$0xff pattern:$0x75316420] }
  0x3f   : > { %327 = vst [vmem:[#allocation1] ss:$2 sm:$0xff] %v291_v0  ;;  %316 = vrot.lane.b32.xlu1 %v312_v3, %s1015_s29  ;;  %318 = vrot.lane.b32.xlu2 %v313_v4, %s1015_s29 }
  0x46   : > { %v328_v5 = vld.sshfl [vmem:[#allocation1] sm:$0xff pattern:$0x75316420]  ;;  %v329_v6 = vld.sshfl [vmem:[#allocation1 + $0x8] sm:$0xff pattern:$0x75316420] }
  0x47   : > { %332 = vrot.lane.b32.xlu0 %v328_v5, %s1016_s15  ;;  %343 = vst [vmem:[#allocation1] ss:$2 sm:$0xff] %v291_v0 }
  0x4e   : > { %v344_v7 = vld.sshfl [vmem:[#allocation1] sm:$0xff pattern:$0x75316420]  ;;  %v345_v8 = vld.sshfl [vmem:[#allocation1 + $0x8] sm:$0xff pattern:$0x75316420] }
  0x4f   : > { %350 = vrot.lane.b32.xlu0 %v345_v8, %s1017_s30  ;;  %359 = vst [vmem:[#allocation1] ss:$2 sm:$0xff] %v291_v0  ;;  %348 = vrot.lane.b32.xlu2 %v344_v7, %s1017_s30 }
  0x56   : > { %v360_v9 = vld.sshfl [vmem:[#allocation1] sm:$0xff pattern:$0x75316420]  ;;  %v361_v10 = vld.sshfl [vmem:[#allocation1 + $0x8] sm:$0xff pattern:$0x75316420] }
  0x57   : > { %375 = vst [vmem:[#allocation1] ss:$2 sm:$0xff] %v291_v0  ;;  %364 = vrot.lane.b32.xlu2 %v360_v9, %s1018_s8 }
  0x5e   : > { %v376_v11 = vld.sshfl [vmem:[#allocation1] sm:$0xff pattern:$0x75316420]  ;;  %v377_v12 = vld.sshfl [vmem:[#allocation1 + $0x8] sm:$0xff pattern:$0x75316420] }
  0x5f   : > { %380 = vrot.lane.b32.xlu0 %v376_v11, %s1019_s9  ;;  %382 = vrot.lane.b32.xlu1 %v377_v12, %s1019_s9  ;;  %391 = vst [vmem:[#allocation1] ss:$2 sm:$0xff] %v291_v0 }
  0x60   : > { %366 = vrot.lane.b32.xlu2 %v361_v10, %s1018_s8 }
  0x66   : > { %v392_v13 = vld.sshfl [vmem:[#allocation1] sm:$0xff pattern:$0x75316420]  ;;  %v393_v14 = vld.sshfl [vmem:[#allocation1 + $0x8] sm:$0xff pattern:$0x75316420] }
  0x67   : > { %396 = vrot.lane.b32.xlu0 %v392_v13, %s1020_s10  ;;  %407 = vst [vmem:[#allocation1] ss:$2 sm:$0xff] %v291_v0 }
  0x68   : > { %298 = vrot.lane.b32.xlu2 %v294_v1, %s1021_s13 }
  0x6e   : > { %v408_v15 = vld.sshfl [vmem:[#allocation1] sm:$0xff pattern:$0x75316420]  ;;  %v409_v16 = vld.sshfl [vmem:[#allocation1 + $0x8] sm:$0xff pattern:$0x75316420] }
  0x6f   : > { %398 = vrot.lane.b32.xlu0 %v393_v14, %s1020_s10  ;;  %412 = vrot.lane.b32.xlu1 %v408_v15, %s1022_s25  ;;  %435 = vst [vmem:[#allocation1] ss:$2 sm:$0xff] %v291_v0  ;;  %v307_v14 = vperm.slane %v1194_v32, 0 }
  0x76   : > { %v1184_v20 = vld.sshfl [vmem:[#allocation1] sm:$0xff pattern:$0x75316420]  ;;  %v1186_v21 = vld.sshfl [vmem:[#allocation1 + $0x8] sm:$0xff pattern:$0x75316420] }
  0x77   : > { %300 = vrot.lane.b32.xlu0 %v295_v2, %s1021_s13  ;;  %414 = vrot.lane.b32.xlu1 %v409_v16, %s1022_s25  ;;  %672 = vst [vmem:[#allocation1] ss:$2 sm:$0xff] %v291_v0 }
  0x7f   : > { %334 = vrot.lane.b32.xlu1 %v329_v6, %s1016_s15 }
  0x87   : > { %465 = vperm.xlu1 %876, %v462_v28  }
  0x99   : > { %v1182_v18 = vpop.permute.xlu2 %318 }
  0xa9   : > { %v349_v23 = vpop.permute.xlu2 %348 }
  0xb1   : > { %v317_v22 = vpop.permute.xlu1 %316  ;;  %v365_v26 = vpop.permute.xlu2 %364 }
  0xb2   : > { %v321_v8 = vsel %vm320_vm5, %v317_v22, %v1182_v18  ;;  %v322_v9 = vsel %vm320_vm5, %v1182_v18, %v317_v22  ;;  %v308_v18 = vperm.slane %v1196_v33, 0  ;;  %v340_v22 = vperm.slane %v1196_v33, 2 }
  0xb3   : > { %v326_v28 = vmul.f32 %v324_v44, %v321_v8 }
  0xb9   : > { %v1180_v17 = vpop.permute.xlu0 %332 }
  0xba   : > { %v367_v38 = vpop.permute.xlu2 %366 }
  0xbb   : > { %v369_v46 = vsel %vm368_vm1, %v365_v26, %v367_v38  ;;  %v370_v47 = vsel %vm368_vm1, %v367_v38, %v365_v26 }
  0xbc   : > { %v373_v55 = vmul.f32 %v371_v42, %v369_v46  ;;  %v374_v56 = vmul.f32 %v372_v43, %v370_v47  ;;  %v426_v47 = vrot.slane %v326_v28, 4 }
  0xbe   : > { %v442_v6 = vrot.slane %v373_v55, 4  ;;  %v443_v7 = vrot.slane %v374_v56, 4 }
  0xc0   : > { %v458_v26 = vsel %vm452_vm6, %v1186_v21, %v443_v7 }
  0xc1   : > { %v351_v19 = vpop.permute.xlu0 %350 }
  0xc2   : > { %v354_v57 = vsel %vm352_vm2, %v351_v19, %v349_v23  ;;  %v353_v1 = vsel %vm352_vm2, %v349_v23, %v351_v19  ;;  %v299_v11 = vpop.permute.xlu2 %298  ;;  %v339_v19 = vperm.slane %v1194_v32, 2 }
  0xc3   : > { %v357_v10 = vmul.f32 %v355_v45, %v354_v57  ;;  %v358_v13 = vmul.f32 %v356_v50, %v353_v1 }
  0xc5   : > { %v431_v30 = vrot.slane %v357_v10, 4 }
  0xd1   : > { %v381_v24 = vpop.permute.xlu0 %380  ;;  %v383_v25 = vpop.permute.xlu1 %382 }
  0xd2   : > { %v385_v58 = vsel %vm384_vm3, %v381_v24, %v383_v25  ;;  %v386_v59 = vsel %vm384_vm3, %v383_v25, %v381_v24  ;;  %v457_v25 = vsel %vm452_vm6, %v1184_v20, %v442_v6 }
  0xd3   : > { %v389_v4 = vmul.f32 %v387_v53, %v385_v58  ;;  %v390_v5 = vmul.f32 %v388_v54, %v386_v59 }
  0xd9   : > { %v397_v27 = vpop.permute.xlu0 %396 }
  0xe1   : > { %v399_v34 = vpop.permute.xlu0 %398  ;;  %v413_v35 = vpop.permute.xlu1 %412 }
  0xe2   : > { %v401_v39 = vsel %vm400_vm0, %v397_v27, %v399_v34  ;;  %v402_v40 = vsel %vm400_vm0, %v399_v34, %v397_v27  ;;  %v325_v27 = vmul.f32 %v323_v41, %v322_v9  ;;  %v432_v34 = vrot.slane %v358_v13, 4 }
  0xe3   : > { %v405_v48 = vmul.f32 %v403_v36, %v401_v39  ;;  %v406_v49 = vmul.f32 %v404_v37, %v402_v40 }
  0xe4   : > { %v425_v46 = vrot.slane %v325_v27, 4 }
  0xe5   : > { %v448_v61 = vrot.slane %v405_v48, 4  ;;  %v449_v62 = vrot.slane %v406_v49, 4 }
  0xe7   : > { %v459_v15 = vsel %vm452_vm6, %v389_v4, %v448_v61  ;;  %v460_v16 = vsel %vm452_vm6, %v390_v5, %v449_v62 }
  0xe9   : > { %v415_v60 = vpop.permute.xlu1 %414  ;;  %v301_v12 = vpop.permute.xlu0 %300 }
  0xea   : > { %v417_v63 = vsel %vm416_vm4, %v413_v35, %v415_v60  ;;  %v418_v0 = vsel %vm416_vm4, %v415_v60, %v413_v35  ;;  %v305_v23 = vsel %vm304_vm7, %v299_v11, %v301_v12  ;;  %v306_v24 = vsel %vm304_vm7, %v301_v12, %v299_v11  ;;  %v617_v11 = vld [vmem:[%s1442_s4] sm:$0xf] }
  0xeb   : > { %v421_v2 = vmul.f32 %v1222_v51, %v417_v63  ;;  %v422_v3 = vmul.f32 %v1224_v52, %v418_v0  ;;  %v309_v21 = vmul.f32 %v307_v14, %v306_v24  ;;  %v310_v38 = vmul.f32 %v308_v18, %v305_v23 }
  0xed   : > { %793 = vmatpush.msk.msra.mxu0 %vm452_vm6, %v421_v2  ;;  %795 = vmatpush.msk.msra.mxu1 %vm452_vm6, %v422_v3  ;;  %v453_v55 = vsel %vm452_vm6, %v309_v21, %v425_v46  ;;  %v454_v56 = vsel %vm452_vm6, %v310_v38, %v426_v47 }
  0xef   : > { %490 = vmatpush.msra.mxu0 %v459_v15  ;;  %510 = vmatpush.msra.mxu1 %v460_v16 }
  0xf1   : > { %v335_v29 = vpop.permute.xlu1 %334  ;;  %491 = vmatpush.msra.mxu0 %v457_v25  ;;  %511 = vmatpush.msra.mxu1 %v458_v26 }
  0xf2   : > { %v337_v35 = vsel %vm336_vm8, %v1180_v17, %v335_v29  ;;  %v338_v20 = vsel %vm336_vm8, %v335_v29, %v1180_v17  ;;  %v461_v17 = vld [vmem:[%s1439_s1] sm:$0xf] }
  0xf3   : > { %v341_v39 = vmul.f32 %v339_v19, %v338_v20  ;;  %v342_v40 = vmul.f32 %v340_v22, %v337_v35 }
  0xf5   : > { %v455_v48 = vsel %vm452_vm6, %v341_v39, %v431_v30  ;;  %v456_v49 = vsel %vm452_vm6, %v342_v40, %v432_v34 }
  0xf6   : > { %492 = vmatpush.msra.mxu0 %v455_v48  ;;  %512 = vmatpush.msra.mxu1 %v456_v49 }
  0xf8   : > { %493 = vmatpush.msra.mxu0 %v453_v55  ;;  %513 = vmatpush.msra.mxu1 %v454_v56 }
  0xf9   : > { %794 = vmatmul.msk.f32.vlgmr.msra.gmra.mxu0 %vm468_vm9, %v461_v17  ;;  %796 = vmatmul.msk.f32.vlgmr.msra.gmra.mxu1 %vm468_vm9, %v461_v17  ;;  %v466_v57 = vpop.permute.xlu1 %465 }
 0x176   : > { %v495_v58 = vpop.f32.mrf.mxu0  ;;  %v515_v59 = vpop.f32.mrf.mxu1 }
 0x177   : > { %v496_v60 = vadd.f32 %v495_v58, %v466_v57  ;;  %v516_v61 = vadd.f32 %v515_v59, %v466_v57 }
 0x179   : > { %v518_v62 = vmax.f32 %v496_v60, 0.0  ;;  %v519_v63 = vmax.f32 %v516_v61, 0.0 }
 0x17b   : > { %570 = vrot.lane.b32.xlu0 %v519_v63, %s1020_s10  ;;  %576 = vrot.lane.b32.xlu1 %v518_v62, %s1022_s25 }
 0x17c   : > { %568 = vrot.lane.b32.xlu2 %v518_v62, %s1020_s10 }
 0x183   : > { %552 = vrot.lane.b32.xlu0 %v518_v62, %s1018_s8  ;;  %554 = vrot.lane.b32.xlu1 %v519_v63, %s1018_s8  ;;  %s807_s8 = sshll.u32 %s1083_s28, 3  ;;  %s686_s28 = scalar_lea.sflag [#allocation4], %s1150_s17 }
 0x184   : > { %578 = vrot.lane.b32.xlu2 %v519_v63, %s1022_s25  ;;  %s286_s25 = scalar_lea.vmem [#allocation7], %s790_s7  ;;  %s960_s7 = scalar_lea.hbm %s1444_s6, 16 }
 0x185   : > { %s699_s19 = sshll.u32 %s286_s25, 4  ;;  %s700_s19 = int_to_ptr.vmem [resolvable:$true] %s699_s19 }
 0x18b   : > { %562 = vrot.lane.b32.xlu0 %v519_v63, %s1019_s9  ;;  %544 = vrot.lane.b32.xlu1 %v518_v62, %s1017_s30 }
 0x18c   : > { %560 = vrot.lane.b32.xlu2 %v518_v62, %s1019_s9 }
 0x193   : > { %528 = vrot.lane.b32.xlu0 %v518_v62, %s1015_s29  ;;  %530 = vrot.lane.b32.xlu1 %v519_v63, %s1015_s29 }
 0x194   : > { %546 = vrot.lane.b32.xlu2 %v519_v63, %s1017_s30 }
 0x19b   : > { %538 = vrot.lane.b32.xlu0 %v519_v63, %s1016_s15  ;;  %520 = vrot.lane.b32.xlu1 %v518_v62, %s1021_s13 }
 0x19c   : > { %536 = vrot.lane.b32.xlu2 %v518_v62, %s1016_s15 }
 0x1a3   : > { %620 = vperm.xlu0 %877, %v617_v11  }
 0x1a4   : > { %522 = vrot.lane.b32.xlu2 %v519_v63, %s1021_s13  ;;  %s697_s13 = scalar_lea.hbm %s1444_s6, %s807_s8 }
 0x1a5   : > { %s701_s26 = sshll.u32 %s697_s13, 4  ;;  %s702_s26 = int_to_ptr.hbm [resolvable:$true] %s701_s26 }
 0x1a6   : > { %s954_s27 = sshra.s32 %s702_s26, 4  ;;  %s955_s27 = int_to_ptr.hbm [resolvable:$true] %s954_s27 }
 0x1a7   : > { %s956_s20 = scalar_lea.hbm %s955_s27, 8  ;;  %p961_p12 = scmp.lt.s32.totalorder %s955_s27, %s1444_s6 }
 0x1a8   : > { %p957_p1 = scmp.ne.s32.totalorder %s955_s27, %s956_s20  ;;  %p962_p8 = scmp.lt.s32.totalorder %s960_s7, %s956_s20 }
 0x1aa   : > { %p958_p3 = pnand %p957_p1, %p1119_p13  ;;  %p963_p7 = por %p962_p8, %p961_p12 }
 0x1ac   : > { %p959_p5 = pneg %p958_p3 }
 0x1ae   : > { %p964_p9 = pnand %p963_p7, %p959_p5 }
 0x1d6   : > { %v569_v0 = vpop.permute.xlu2 %568 }
 0x1de   : > { %v579_v1 = vpop.permute.xlu2 %578 }
 0x1e6   : > { %v561_v4 = vpop.permute.xlu2 %560 }
 0x1ed   : > { %v571_v2 = vpop.permute.xlu0 %570  ;;  %v577_v3 = vpop.permute.xlu1 %576 }
 0x1ee   : > { %v580_v5 = vsel %vm416_vm4, %v577_v3, %v579_v1  ;;  %v581_v6 = vsel %vm416_vm4, %v579_v1, %v577_v3  ;;  %v572_v12 = vsel %vm400_vm0, %v569_v0, %v571_v2  ;;  %v573_v13 = vsel %vm400_vm0, %v571_v2, %v569_v0 }
 0x1ef   : > { %v582_v7 = vmul.f32 %v1222_v51, %v580_v5  ;;  %v583_v8 = vmul.f32 %v1224_v52, %v581_v6  ;;  %v547_v51 = vpop.permute.xlu2 %546  ;;  %v574_v16 = vmul.f32 %v572_v12, %v403_v36  ;;  %v575_v23 = vmul.f32 %v573_v13, %v404_v37  ;;  %v674_v5 = vld.sshfl [vmem:[#allocation1 + $0x8] sm:$0xff pattern:$0x75316420] }
 0x1f1   : > { %797 = vmatpush.msk.msra.mxu2 %vm452_vm6, %v582_v7  ;;  %799 = vmatpush.msk.msra.mxu3 %vm452_vm6, %v583_v8  ;;  %v604_v28 = vrot.slane %v574_v16, 4  ;;  %v605_v29 = vrot.slane %v575_v23, 4  ;;  %v673_v8 = vld.sshfl [vmem:[#allocation1] sm:$0xff pattern:$0x75316420] }
 0x1f5   : > { %v553_v9 = vpop.permute.xlu0 %552  ;;  %v555_v10 = vpop.permute.xlu1 %554 }
 0x1f6   : > { %v556_v52 = vsel %vm368_vm1, %v553_v9, %v555_v10  ;;  %v557_v15 = vsel %vm368_vm1, %v555_v10, %v553_v9 }
 0x1f7   : > { %v558_v24 = vmul.f32 %v556_v52, %v371_v42  ;;  %v559_v25 = vmul.f32 %v557_v15, %v372_v43  ;;  %v537_v21 = vpop.permute.xlu2 %536 }
 0x1f9   : > { %v598_v36 = vrot.slane %v558_v24, 4  ;;  %v599_v35 = vrot.slane %v559_v25, 4 }
 0x1fb   : > { %v612_v38 = vsel %vm452_vm6, %v518_v62, %v598_v36  ;;  %v613_v39 = vsel %vm452_vm6, %v519_v63, %v599_v35 }
 0x1fd   : > { %v563_v26 = vpop.permute.xlu0 %562  ;;  %v545_v27 = vpop.permute.xlu1 %544 }
 0x1fe   : > { %v564_v30 = vsel %vm384_vm3, %v561_v4, %v563_v26  ;;  %v565_v34 = vsel %vm384_vm3, %v563_v26, %v561_v4 }
 0x1ff   : > { %v566_v37 = vmul.f32 %v564_v30, %v387_v53  ;;  %v567_v42 = vmul.f32 %v565_v34, %v388_v54  ;;  %v548_v53 = vsel %vm352_vm2, %v545_v27, %v547_v51  ;;  %v549_v54 = vsel %vm352_vm2, %v547_v51, %v545_v27  ;;  %v523_v55 = vpop.permute.xlu2 %522 }
 0x200   : > { %v550_v47 = vmul.f32 %v549_v54, %v355_v45  ;;  %v551_v48 = vmul.f32 %v548_v53, %v356_v50 }
 0x201   : > { %v614_v43 = vsel %vm452_vm6, %v566_v37, %v604_v28  ;;  %v615_v20 = vsel %vm452_vm6, %v567_v42, %v605_v29 }
 0x202   : > { %644 = vmatpush.msra.mxu2 %v614_v43  ;;  %664 = vmatpush.msra.mxu3 %v615_v20  ;;  %v592_v56 = vrot.slane %v550_v47, 4  ;;  %v593_v57 = vrot.slane %v551_v48, 4 }
 0x204   : > { %645 = vmatpush.msra.mxu2 %v612_v38  ;;  %665 = vmatpush.msra.mxu3 %v613_v39 }
 0x205   : > { %v529_v40 = vpop.permute.xlu0 %528  ;;  %v531_v46 = vpop.permute.xlu1 %530 }
 0x206   : > { %v532_v49 = vsel %vm320_vm5, %v529_v40, %v531_v46  ;;  %v533_v17 = vsel %vm320_vm5, %v531_v46, %v529_v40 }
 0x207   : > { %v534_v58 = vmul.f32 %v533_v17, %v323_v41  ;;  %v535_v59 = vmul.f32 %v532_v49, %v324_v44 }
 0x209   : > { %v586_v2 = vrot.slane %v534_v58, 4  ;;  %v587_v3 = vrot.slane %v535_v59, 4 }
 0x20d   : > { %v539_v60 = vpop.permute.xlu0 %538  ;;  %v521_v45 = vpop.permute.xlu1 %520 }
 0x20e   : > { %v540_v50 = vsel %vm336_vm8, %v537_v21, %v539_v60  ;;  %v541_v61 = vsel %vm336_vm8, %v539_v60, %v537_v21  ;;  %v524_v62 = vsel %vm304_vm7, %v521_v45, %v523_v55  ;;  %v525_v63 = vsel %vm304_vm7, %v523_v55, %v521_v45 }
 0x20f   : > { %v542_v41 = vmul.f32 %v541_v61, %v339_v19  ;;  %v543_v44 = vmul.f32 %v540_v50, %v340_v22  ;;  %v526_v0 = vmul.f32 %v525_v63, %v307_v14  ;;  %v527_v1 = vmul.f32 %v524_v62, %v308_v18  ;;  %v616_v19 = vld [vmem:[%s1441_s3] sm:$0xf] }
 0x211   : > { %v610_v4 = vsel %vm452_vm6, %v542_v41, %v592_v56  ;;  %v611_v31 = vsel %vm452_vm6, %v543_v44, %v593_v57  ;;  %v608_v22 = vsel %vm452_vm6, %v526_v0, %v586_v2  ;;  %v609_v32 = vsel %vm452_vm6, %v527_v1, %v587_v3 }
 0x212   : > { %646 = vmatpush.msra.mxu2 %v610_v4  ;;  %666 = vmatpush.msra.mxu3 %v611_v31 }
 0x214   : > { %647 = vmatpush.msra.mxu2 %v608_v22  ;;  %667 = vmatpush.msra.mxu3 %v609_v32 }
 0x215   : > { %798 = vmatmul.msk.f32.vlgmr.msra.gmra.mxu2 %vm468_vm9, %v616_v19  ;;  %800 = vmatmul.msk.f32.vlgmr.msra.gmra.mxu3 %vm468_vm9, %v616_v19  ;;  %v621_v33 = vpop.permute.xlu0 %620 }
 0x298   : > { %v649_v14 = vpop.f32.mrf.mxu2  ;;  %v669_v18 = vpop.f32.mrf.mxu3 }
 0x299   : > { %v650_v6 = vadd.f32 %v649_v14, %v621_v33  ;;  %v670_v7 = vadd.f32 %v669_v18, %v621_v33 }
 0x29b   : > { %v678_v9 = vadd.f32 %v674_v5, %v670_v7  ;;  %v677_v10 = vadd.f32 %v673_v8, %v650_v6 }
 0x29d   : > { %v681_v11 = vrot.slane %v678_v9, 4 }
 0x29f   : > { %v682_v12 = vsel %vm452_vm6, %v677_v10, %v681_v11 }
 0x2a0   : > { %684 = vst [vmem:[%s286_s25] sm:$0xff] %v682_v12 }
 0x2a1   : > { %967 = shalt.err (!%p964_p9)
}
 0x2a2   : > { %814 = dma.vmem_to_hbm [thread:$0]  (%p1119_p13), %s700_s19, 128, %s702_s26, %s686_s28  }
 0x2a3 PF: > { %s713_s17 = sand.u32 1, %s998_s21   ;;  %p1450_p10 = scmp.ge.s32.totalorder %s1010_s24, 2 }
 0x2a4   : > { %s714_s8 = scalar_lea.sflag [#allocation4], %s713_s17 }
 0x2a5   : > { %p825_p11 = pnand %p1450_p10, %p1124_p4 }
 0x2a7   : > { %p826_p0 = pneg %p825_p11 }
 0x2a9   : > { %993 = dma.done.wait (%p826_p0), %s714_s8, 128  }
 0x2aa   : > { %995 = vsyncadd (%p826_p0), %s714_s8, 4294967168  ;;  %p20_p2 = scmp.ge.s32.totalorder %s1099_s11, 4   ;;  %s1451_s21 = smov %s1002_s22 }
 0x2ab   : > { %s1452_s22 = smov %s1006_s23  ;;  %s1453_s23 = smov %s1111_s14 }
 0x2ac   : > { %s1454_s24 = smov %s1099_s11  ;;  %22 = sbr.rel (!%p20_p2) target bundleno = 6 (0x6), region = 93 }
 0x2b1   :  { %720 = vsyncpa [#allocation3], 1 }
 0x2b2   :  { %722 = vsyncpa [#allocation3 + $0x1], 1 }
 0x2b3   :  { %723 = vsyncpa [#allocation6], 1 }
 0x2b4   :  { %724 = vsyncpa [#allocation4], 1 }
 0x2b5   :  { %726 = vsyncpa [#allocation4 + $0x1], 1 }

</bundles_post_ra>
